<compile_context>
chip_gen: v6e
topology: v6e:2x2x1
jax: 0.10.0
libtpu: 0.0.40
codegen_flags: <defaults>
</compile_context>

<pallas_src>
import jax
import jax.numpy as jnp
from jax import lax
from jax.experimental import pallas as pl
from jax.experimental.pallas import tpu as pltpu


_INV_SQRT2 = 0.7071067811865476


def _sentence_head_kernel(emb_ref, mask_ref, w_ref, b_ref, out_ref,
                          acc_ref, cnt_ref):
    """Grid = (batch_tiles [parallel], seq_tiles [arbitrary / reduction-last]).

    emb_ref  : [TB, TS, H]  native backbone dtype (f32/bf16), upcast in-kernel
    mask_ref : [TB, TS]     native mask dtype (int32/f32/...), upcast in-kernel
    w_ref    : [H, Dp]      fc weight (single-buffered, VMEM resident)
    b_ref    : [1, Dp]      fc bias f32
    out_ref  : [TB, Dp]     f32  (Dp = lane-padded output dim)
    acc_ref  : [TB, H]      f32 scratch: masked embedding sum
    cnt_ref  : [TB, 1]      f32 scratch: valid-token count
    """
    k = pl.program_id(1)

    @pl.when(k == 0)
    def _():
        acc_ref[...] = jnp.zeros_like(acc_ref)
        cnt_ref[...] = jnp.zeros_like(cnt_ref)

    # Masked partial sums over this sequence tile (f32 accumulation).
    emb = emb_ref[...].astype(jnp.float32)          # [TB, TS, H]
    mask = mask_ref[...].astype(jnp.float32)        # [TB, TS]
    acc_ref[...] += jnp.sum(emb * mask[:, :, None], axis=1)
    cnt_ref[...] += jnp.sum(mask, axis=1, keepdims=True)

    @pl.when(k == pl.num_programs(1) - 1)
    def _():
        # mean pooling: sum / clamp(count, min=1e-10)  (matches torch.clamp+div)
        pooled = acc_ref[...] / jnp.maximum(cnt_ref[...], 1e-10)   # [TB, H]
        # fc on the MXU (pooled cast to the resident weight dtype; f32 accumulate)
        y = jnp.dot(pooled.astype(w_ref.dtype), w_ref[...],
                    preferred_element_type=jnp.float32)
        y = y + b_ref[...]
        # exact (erf) GELU = PyTorch nn.GELU() default
        y = 0.5 * y * (1.0 + lax.erf(y * _INV_SQRT2))
        out_ref[...] = y.astype(out_ref.dtype)


def _pick_tiles(B, S, H, Dp, emb_itemsize, mask_itemsize, w_itemsize,
                vmem_capacity, emb_buffers=2):
    """Pick (TB, TS) so everything resident in VMEM fits the budget.

    Budgets: emb stream (emb_buffers deep) + its f32 upcast working set,
    mask stream, single-buffered weight + bias, double-buffered output tile,
    and the f32 accumulator scratch.
    """
    total_budget = min(int(vmem_capacity * 0.65), 88 << 20)

    resident = H * Dp * w_itemsize + Dp * 4          # weight (Buffered(1)) + bias

    def cost(tb, ts):
        emb_stream = emb_buffers * tb * ts * H * emb_itemsize
        emb_f32_ws = tb * ts * H * 4                 # in-kernel f32 upcast temporaries
        mask_stream = 2 * tb * ts * max(mask_itemsize, 4)
        out_bufs = 2 * tb * Dp * 4
        scratch = tb * H * 4 + tb * 128 * 4          # acc + (padded) cnt
        return resident + emb_stream + emb_f32_ws + mask_stream + out_bufs + scratch

    # Candidate batch tiles: multiples of 8 dividing B (else the whole batch).
    if B % 8 == 0:
        tb_cands = [tb for tb in range(8, B + 1, 8) if B % tb == 0]
    else:
        tb_cands = [B]
    # Candidate seq tiles: multiples of 128 dividing S (else the whole sequence).
    ts_cands = [ts for ts in range(128, S + 1, 128) if S % ts == 0]
    if not ts_cands:
        ts_cands = [S]

    fitting = [(tb, ts) for tb in tb_cands for ts in ts_cands
               if cost(tb, ts) <= total_budget]
    if not fitting:
        # Nothing fits the estimate: take the smallest legal tiles and rely on
        # the raised vmem_limit (never return a full-S block known not to fit).
        return min(tb_cands), min(ts_cands)

    # Prefer >=2 batch tiles when the batch allows so the "parallel" axis can
    # shard across v7x's 2 TensorCores (costs nothing on single-TC v5e/v6e).
    if B >= 16:
        multi = [c for c in fitting if B // c[0] >= 2]
        if multi:
            fitting = multi

    # Largest embedding block wins (HBM-bound: big DMA blocks amortize the
    # ~0.35us/step overhead); tie-break on larger TS (fewer reduction rounds).
    return max(fitting, key=lambda c: (c[0] * c[1], c[1]))


def sentence_transformer_head(encoder_embeddings, attention_mask, fc_weight,
                              fc_bias, *, emb_buffers=2):
    """Pallas head for CustomSentenceTransformer.

    encoder_embeddings: [B, S, H]  (native backbone dtype: f32 or bf16 --
                                    keep bf16 at the call site, the kernel upcasts)
    attention_mask:     [B, S]     (any numeric/bool dtype; treated like .float())
    fc_weight:          [H, D]     (transpose of torch Linear.weight)
    fc_bias:            [D]
    emb_buffers:        pipeline depth for the embedding stream (sweep 3 on v7x
                        if the profile shows DMA gaps between grid steps).
    Returns (sentence_embedded [B, D] f32, encoder_embeddings unchanged).
    """
    B, S, H = encoder_embeddings.shape
    D = fc_weight.shape[1]
    Dp = ((D + 127) // 128) * 128                    # lane-dense output width

    # Bool masks need a real numeric dtype for the VMEM stream; everything else
    # streams in its native dtype and is upcast inside the kernel.
    if attention_mask.dtype == jnp.bool_:
        attention_mask = attention_mask.astype(jnp.int32)

    # Keep the resident weight in bf16 once it is large enough for VMEM
    # pressure to matter (v7x's 64 MiB/TC); small heads stay f32 for accuracy.
    w_dtype = jnp.bfloat16 if H * Dp * 4 > (8 << 20) else jnp.float32
    # NOTE: under jit these pads are constant-folded; if the wrapper is not
    # jitted, hoist the padding to parameter-load time.
    w_pad = jnp.zeros((H, Dp), w_dtype).at[:, :D].set(fc_weight.astype(w_dtype))
    b_pad = jnp.zeros((1, Dp), jnp.float32).at[:, :D].set(
        fc_bias.astype(jnp.float32).reshape(1, D))

    try:
        vmem_cap = int(pltpu.get_tpu_info().vmem_capacity_bytes)
    except Exception:
        vmem_cap = 64 << 20                          # conservative (v7x) fallback
    vmem_limit = min(int(vmem_cap * 0.85), 110 << 20)

    TB, TS = _pick_tiles(B, S, H, Dp,
                         encoder_embeddings.dtype.itemsize,
                         attention_mask.dtype.itemsize,
                         jnp.dtype(w_dtype).itemsize,
                         vmem_cap, emb_buffers=emb_buffers)
    assert B % TB == 0 and S % TS == 0, (B, TB, S, TS)
    grid = (B // TB, S // TS)

    emb_mode = pl.Buffered(emb_buffers) if emb_buffers != 2 else None

    out_padded = pl.pallas_call(
        _sentence_head_kernel,
        out_shape=jax.ShapeDtypeStruct((B, Dp), jnp.float32),
        grid_spec=pltpu.PrefetchScalarGridSpec(
            num_scalar_prefetch=0,
            grid=grid,
            in_specs=[
                # embedding stream (only large DMA; pipelined/double-buffered)
                pl.BlockSpec((TB, TS, H), lambda i, k: (i, k, 0),
                             pipeline_mode=emb_mode),
                # mask stream (native dtype, tiny)
                pl.BlockSpec((TB, TS), lambda i, k: (i, k)),
                # fc weight / bias: constant block index -> single-buffered
                pl.BlockSpec((H, Dp), lambda i, k: (0, 0),
                             pipeline_mode=pl.Buffered(1)),
                pl.BlockSpec((1, Dp), lambda i, k: (0, 0),
                             pipeline_mode=pl.Buffered(1)),
            ],
            out_specs=pl.BlockSpec((TB, Dp), lambda i, k: (i, 0)),
            scratch_shapes=[pltpu.VMEM((TB, H), jnp.float32),   # masked sum acc
                            pltpu.VMEM((TB, 1), jnp.float32)],  # token counts
        ),
        compiler_params=pltpu.CompilerParams(
            dimension_semantics=("parallel", "arbitrary"),
            vmem_limit_bytes=vmem_limit,
        ),
    )(encoder_embeddings, attention_mask, w_pad, b_pad)

    sentence_embedded = out_padded[:, :D]
    return sentence_embedded, encoder_embeddings


def _reference(encoder_embeddings, attention_mask, fc_weight, fc_bias):
    mask = attention_mask.astype(jnp.float32)[:, :, None]
    emb_sum = jnp.sum(encoder_embeddings.astype(jnp.float32) * mask, axis=1)
    counts = jnp.clip(jnp.sum(mask, axis=1), 1e-10, None)
    pooled = emb_sum / counts
    y = pooled @ fc_weight + fc_bias
    return jax.nn.gelu(y, approximate=False)


if __name__ == "__main__":
    # Small shapes consistent with the forward pass:
    #   batch=2, seq=8, encoder_embedding_size=32, sentence_embedding_size=32
    B, S, H, D = 2, 8, 32, 32

    key = jax.random.PRNGKey(0)
    k_emb, k_w, k_b = jax.random.split(key, 3)

    encoder_embeddings = jax.random.normal(k_emb, (B, S, H), dtype=jnp.float32)
    # deterministic attention mask: first batch has 5 valid tokens, second has 8
    attention_mask = jnp.array(
        [[1, 1, 1, 1, 1, 0, 0, 0],
         [1, 1, 1, 1, 1, 1, 1, 1]], dtype=jnp.int32
    )

    # Deterministic fc params (nn.Linear(H, D)); stored as [H, D].
    fc_weight = (jax.random.normal(k_w, (H, D), dtype=jnp.float32)
                 * (1.0 / jnp.sqrt(jnp.float32(H))))
    fc_bias = jax.random.normal(k_b, (D,), dtype=jnp.float32) * 0.01

    sent_emb, enc_emb_out = sentence_transformer_head(
        encoder_embeddings, attention_mask, fc_weight, fc_bias
    )
    jax.block_until_ready(sent_emb)
    jax.block_until_ready(enc_emb_out)

    ref = _reference(encoder_embeddings, attention_mask, fc_weight, fc_bias)
    assert sent_emb.shape == (B, D)
    assert enc_emb_out.shape == (B, S, H)
    assert jnp.allclose(sent_emb, ref, atol=1e-5, rtol=1e-5)
    assert jnp.array_equal(enc_emb_out, encoder_embeddings)

    print("KERNEL_OK")
</pallas_src>

<mosaic_0001>
module attributes {stable_mosaic.version = 11 : i64} {
  func.func @_sentence_head_kernel(%arg0: i32, %arg1: i32, %arg2: memref<2x8x32xf32, #tpu.memory_space<vmem>>, %arg3: memref<2x8xi32, #tpu.memory_space<vmem>>, %arg4: memref<32x128xf32, #tpu.memory_space<vmem>>, %arg5: memref<1x128xf32, #tpu.memory_space<vmem>>, %arg6: memref<2x128xf32, #tpu.memory_space<vmem>>, %arg7: memref<2x32xf32, #tpu.memory_space<vmem>>, %arg8: memref<2x1xf32, #tpu.memory_space<vmem>>) attributes {dimension_semantics = [#tpu.dimension_semantics<parallel>, #tpu.dimension_semantics<arbitrary>], iteration_bounds = array<i64: 1, 1>, scalar_prefetch = 0 : i64, scratch_operands = 2 : i64, tpu.core_type = #tpu.core_type<tc>, window_params = [{transform_indices = @transform_0, window_bounds = array<i64: 2, 8, 32>}, {transform_indices = @transform_1, window_bounds = array<i64: 2, 8>}, {pipeline_mode = #tpu.pipeline_mode<synchronous>, transform_indices = @transform_2, window_bounds = array<i64: 32, 128>}, {pipeline_mode = #tpu.pipeline_mode<synchronous>, transform_indices = @transform_3, window_bounds = array<i64: 1, 128>}, {transform_indices = @transform_4, window_bounds = array<i64: 2, 128>}]} {
    %c0_i32 = arith.constant 0 : i32
    %0 = arith.cmpi eq, %arg1, %c0_i32 : i32
    %1 = arith.extui %0 : i1 to i32
    %c0_i32_0 = arith.constant 0 : i32
    %2 = arith.cmpi ne, %1, %c0_i32_0 : i32
    scf.if %2 {
      %cst_16 = arith.constant 0.000000e+00 : f32
      %21 = vector.broadcast %cst_16 : f32 to vector<2x32xf32>
      %c0_17 = arith.constant 0 : index
      %c0_18 = arith.constant 0 : index
      %22 = vector.load %arg7[%c0_17, %c0_18] : memref<2x32xf32, #tpu.memory_space<vmem>>, vector<2x32xf32>
      tpu.vector_store %arg7[%c0_17, %c0_18], %21 {strides = array<i32>} : memref<2x32xf32, #tpu.memory_space<vmem>>, vector<2x32xf32>,
      %cst_19 = arith.constant 0.000000e+00 : f32
      %23 = vector.broadcast %cst_19 : f32 to vector<2x1xf32>
      %c0_20 = arith.constant 0 : index
      %c0_21 = arith.constant 0 : index
      %24 = vector.load %arg8[%c0_20, %c0_21] : memref<2x1xf32, #tpu.memory_space<vmem>>, vector<2x1xf32>
      tpu.vector_store %arg8[%c0_20, %c0_21], %23 {strides = array<i32>} : memref<2x1xf32, #tpu.memory_space<vmem>>, vector<2x1xf32>,
    } else {
    }
    %c0 = arith.constant 0 : index
    %c0_1 = arith.constant 0 : index
    %c0_2 = arith.constant 0 : index
    %3 = vector.load %arg2[%c0, %c0_1, %c0_2] : memref<2x8x32xf32, #tpu.memory_space<vmem>>, vector<2x8x32xf32>
    %c0_3 = arith.constant 0 : index
    %c0_4 = arith.constant 0 : index
    %4 = vector.load %arg3[%c0_3, %c0_4] : memref<2x8xi32, #tpu.memory_space<vmem>>, vector<2x8xi32>
    %5 = arith.sitofp %4 : vector<2x8xi32> to vector<2x8xf32>
    %c0_5 = arith.constant 0 : index
    %c0_6 = arith.constant 0 : index
    %6 = vector.load %arg7[%c0_5, %c0_6] : memref<2x32xf32, #tpu.memory_space<vmem>>, vector<2x32xf32>
    %7 = vector.shape_cast %5 : vector<2x8xf32> to vector<2x8x1xf32>
    %8 = vector.broadcast %7 : vector<2x8x1xf32> to vector<2x8x32xf32>
    %9 = arith.mulf %3, %8 : vector<2x8x32xf32>
    %cst = arith.constant dense<0.000000e+00> : vector<2x32xf32>
    %10 = vector.multi_reduction <add>, %9, %cst [1] : vector<2x8x32xf32> to vector<2x32xf32>
    %11 = arith.addf %6, %10 : vector<2x32xf32>
    %c0_7 = arith.constant 0 : index
    %c0_8 = arith.constant 0 : index
    %12 = vector.load %arg7[%c0_7, %c0_8] : memref<2x32xf32, #tpu.memory_space<vmem>>, vector<2x32xf32>
    tpu.vector_store %arg7[%c0_7, %c0_8], %11 {strides = array<i32>} : memref<2x32xf32, #tpu.memory_space<vmem>>, vector<2x32xf32>,
    %c0_9 = arith.constant 0 : index
    %c0_10 = arith.constant 0 : index
    %13 = vector.load %arg8[%c0_9, %c0_10] : memref<2x1xf32, #tpu.memory_space<vmem>>, vector<2x1xf32>
    %cst_11 = arith.constant dense<0.000000e+00> : vector<2xf32>
    %14 = vector.multi_reduction <add>, %5, %cst_11 [1] : vector<2x8xf32> to vector<2xf32>
    %15 = vector.shape_cast %14 : vector<2xf32> to vector<2x1xf32>
    %16 = arith.addf %13, %15 : vector<2x1xf32>
    %c0_12 = arith.constant 0 : index
    %c0_13 = arith.constant 0 : index
    %17 = vector.load %arg8[%c0_12, %c0_13] : memref<2x1xf32, #tpu.memory_space<vmem>>, vector<2x1xf32>
    tpu.vector_store %arg8[%c0_12, %c0_13], %16 {strides = array<i32>} : memref<2x1xf32, #tpu.memory_space<vmem>>, vector<2x1xf32>,
    %c0_i32_14 = arith.constant 0 : i32
    %18 = arith.cmpi eq, %arg1, %c0_i32_14 : i32
    %19 = arith.extui %18 : i1 to i32
    %c0_i32_15 = arith.constant 0 : i32
    %20 = arith.cmpi ne, %19, %c0_i32_15 : i32
    scf.if %20 {
      %c0_16 = arith.constant 0 : index
      %c0_17 = arith.constant 0 : index
      %21 = vector.load %arg7[%c0_16, %c0_17] : memref<2x32xf32, #tpu.memory_space<vmem>>, vector<2x32xf32>
      %c0_18 = arith.constant 0 : index
      %c0_19 = arith.constant 0 : index
      %22 = vector.load %arg8[%c0_18, %c0_19] : memref<2x1xf32, #tpu.memory_space<vmem>>, vector<2x1xf32>
      %cst_20 = arith.constant 1.000000e-10 : f32
      %23 = vector.broadcast %cst_20 : f32 to vector<2x1xf32>
      %24 = arith.maximumf %22, %23 : vector<2x1xf32>
      %25 = vector.broadcast %24 : vector<2x1xf32> to vector<2x32xf32>
      %26 = arith.divf %21, %25 : vector<2x32xf32>
      %c0_21 = arith.constant 0 : index
      %c0_22 = arith.constant 0 : index
      %27 = vector.load %arg4[%c0_21, %c0_22] : memref<32x128xf32, #tpu.memory_space<vmem>>, vector<32x128xf32>
      %cst_23 = arith.constant dense<0.000000e+00> : vector<2x128xf32>
      %28 = tpu.matmul %26, %27, %cst_23 {dimension_numbers = #tpu.dot_dimension_numbers<[1], [0], [0], [1], [0, 0, 1, 1], [], []>} : vector<2x32xf32>, vector<32x128xf32>, vector<2x128xf32> -> vector<2x128xf32>
      %c0_24 = arith.constant 0 : index
      %c0_25 = arith.constant 0 : index
      %29 = vector.load %arg5[%c0_24, %c0_25] : memref<1x128xf32, #tpu.memory_space<vmem>>, vector<1x128xf32>
      %30 = vector.broadcast %29 : vector<1x128xf32> to vector<2x128xf32>
      %31 = arith.addf %28, %30 : vector<2x128xf32>
      %cst_26 = arith.constant 5.000000e-01 : f32
      %32 = vector.broadcast %cst_26 : f32 to vector<2x128xf32>
      %33 = arith.mulf %32, %31 : vector<2x128xf32>
      %cst_27 = arith.constant 0.707106769 : f32
      %34 = vector.broadcast %cst_27 : f32 to vector<2x128xf32>
      %35 = arith.mulf %31, %34 : vector<2x128xf32>
      %36 = math.erf %35 : vector<2x128xf32>
      %cst_28 = arith.constant 1.000000e+00 : f32
      %37 = vector.broadcast %cst_28 : f32 to vector<2x128xf32>
      %38 = arith.addf %37, %36 : vector<2x128xf32>
      %39 = arith.mulf %33, %38 : vector<2x128xf32>
      %c0_29 = arith.constant 0 : index
      %c0_30 = arith.constant 0 : index
      %40 = vector.load %arg6[%c0_29, %c0_30] : memref<2x128xf32, #tpu.memory_space<vmem>>, vector<2x128xf32>
      tpu.vector_store %arg6[%c0_29, %c0_30], %39 {strides = array<i32>} : memref<2x128xf32, #tpu.memory_space<vmem>>, vector<2x128xf32>,
    } else {
    }
    return
  }
  func.func @transform_0(%arg0: i32, %arg1: i32) -> (i32, i32, i32) {
    %c0_i32 = arith.constant 0 : i32
    %c0_i32_0 = arith.constant 0 : i32
    return %arg0, %arg1, %c0_i32 : i32, i32, i32
  }
  func.func @transform_1(%arg0: i32, %arg1: i32) -> (i32, i32) {
    %c0_i32 = arith.constant 0 : i32
    return %arg0, %arg1 : i32, i32
  }
  func.func @transform_2(%arg0: i32, %arg1: i32) -> (i32, i32) {
    %c0_i32 = arith.constant 0 : i32
    %c0_i32_0 = arith.constant 0 : i32
    %c0_i32_1 = arith.constant 0 : i32
    return %c0_i32, %c0_i32_0 : i32, i32
  }
  func.func @transform_3(%arg0: i32, %arg1: i32) -> (i32, i32) {
    %c0_i32 = arith.constant 0 : i32
    %c0_i32_0 = arith.constant 0 : i32
    %c0_i32_1 = arith.constant 0 : i32
    return %c0_i32, %c0_i32_0 : i32, i32
  }
  func.func @transform_4(%arg0: i32, %arg1: i32) -> (i32, i32) {
    %c0_i32 = arith.constant 0 : i32
    %c0_i32_0 = arith.constant 0 : i32
    return %arg0, %c0_i32 : i32, i32
  }
}

</mosaic_0001>

<bundles_post_ra>
// kernel: tpu_custom_call.1
= control target key start
LH: loop header
LB: loop body
LE: loop exit
PB: predicated region body
PF: predicated region fallthrough
CT: control target
= control target key end

     0   :  { %9 = vsyncpa [#allocation5], 0  ;;  %s411_s0 = inlined_call_operand.hbm [shape: f32[2,8,32], index: 0, kind: input, shape index: {}]   ;;  %s412_s1 = inlined_call_operand.hbm [shape: s32[2,8], index: 1, kind: input, shape index: {}]   ;;  %s413_s2 = inlined_call_operand.hbm [shape: f32[32,128], index: 2, kind: input, shape index: {}]   ;;  %s414_s3 = inlined_call_operand.vmem [shape: f32[1,128], index: 3, kind: input, shape index: {}]   ;;  %s415_s4 = inlined_call_operand.hbm [shape: f32[2,128], index: 4, kind: output, shape index: {}]  }
   0x1   :  { %10 = vsyncpa [#allocation8], 0 }
   0x2   :  { %11 = vsyncpa [#allocation6], 0  ;;  %s355_s15 = smov [#allocation7]   ;;  %s356_s17 = smov [#allocation4]  }
   0x3   :  { %s30_s16 = sshll.u32 %s355_s15, 4  ;;  %s17_s18 = sshll.u32 %s356_s17, 4  ;;  %s31_s16 = int_to_ptr.vmem [resolvable:$true] %s30_s16  ;;  %s18_s18 = int_to_ptr.vmem [resolvable:$true] %s17_s18 }
   0x4   :  { %s277_s19 = scalar_lea.vmem %s31_s16, 32  ;;  %p282_p1 = scmp.lt.s32.totalorder %s31_s16, %s31_s16 }
   0x5   :  { %p278_p0 = scmp.ne.s32.totalorder %s31_s16, %s277_s19  ;;  %p283_p2 = scmp.lt.s32.totalorder %s277_s19, %s277_s19 }
   0x7   :  { %p284_p3 = por %p283_p2, %p282_p1 }
   0x9   :  { %p285_p4 = pnand %p284_p3, %p278_p0 }
   0xb   :  { %288 = shalt.err (!%p285_p4)
}
   0xc   :  { %33 = dma.hbm_to_vmem [thread:$0]  %s412_s1, 32, %s31_s16, [#allocation8]  }
   0xd   :  { %s297_s22 = scalar_lea.vmem %s18_s18, 256  ;;  %p302_p6 = scmp.lt.s32.totalorder %s18_s18, %s18_s18 }
   0xe   :  { %p298_p5 = scmp.ne.s32.totalorder %s18_s18, %s297_s22  ;;  %p303_p7 = scmp.lt.s32.totalorder %s297_s22, %s297_s22 }
  0x10   :  { %p304_p8 = por %p303_p7, %p302_p6 }
  0x12   :  { %p305_p9 = pnand %p304_p8, %p298_p5 }
  0x14   :  { %308 = shalt.err (!%p305_p9)
}
  0x15   :  { %s357_s23 = smov 128   ;;  %s358_s24 = smov 8  }
  0x16   :  { %23 = dma.hbm_to_vmem [thread:$0]  %s411_s0, 256, %s18_s18, [#allocation5], %s357_s23, %s357_s23, %s358_s24  }
  0x17   :  { %s359_s27 = smov [#allocation9]  }
  0x18   :  { %s39_s28 = sshll.u32 %s359_s27, 4  ;;  %s40_s28 = int_to_ptr.vmem [resolvable:$true] %s39_s28 }
  0x19   :  { %s317_s29 = scalar_lea.vmem %s40_s28, 512  ;;  %p322_p11 = scmp.lt.s32.totalorder %s40_s28, %s40_s28 }
  0x1a   :  { %p318_p10 = scmp.ne.s32.totalorder %s40_s28, %s317_s29  ;;  %p323_p12 = scmp.lt.s32.totalorder %s317_s29, %s317_s29 }
  0x1c   :  { %p324_p13 = por %p323_p12, %p322_p11 }
  0x1e   :  { %p325_p0 = pnand %p324_p13, %p318_p10 }
  0x20   :  { %328 = shalt.err (!%p325_p0)
}
  0x21   :  { %45 = dma.hbm_to_vmem [thread:$0]  %s413_s2, 512, %s40_s28, [#allocation8], %s357_s23, %s357_s23, %s358_s24  }
  0x22   :  { %349 = dma.done.wait [#allocation5], 256  }
  0x23   :  { %350 = vsyncadd [#allocation5], 4294967040 }
  0x24   :  { %351 = dma.done.wait [#allocation8], 544  }
  0x25   :  { %352 = vsyncadd [#allocation8], 4294966752  ;;  %vm63_vm0 = vcmask 1024   ;;  %v360_v0 = vmov 0.0   ;;  %v67_v1 = vld [vmem:[#allocation7] sm:$0x3]  ;;  %v70_v4 = vlaneseq }
  0x26   :  { %64 = vst.msk [vmem:[#allocation3] sm:$0x3] %vm63_vm0, %v360_v0  ;;  %243 = vmatprep.subr.mxu0 %v360_v0  ;;  %vm110_vm1 = vcmask 58368   ;;  %v68_v2 = vcvt.s32.f32 %v67_v1  ;;  %v361_v8 = vmov 0   ;;  %vm61_vm2 = vcmask 254976   ;;  %v66_v11 = vld [vmem:[#allocation4 + $0x8] sm:$0xff] }
  0x27   :  { %v71_v5 = vshrl.u32 %v70_v4, 7  ;;  %263 = vset.pattern.permute.xlu1 %v361_v8  ;;  %264 = vset.pattern.permute.xlu0 %v361_v8  ;;  %62 = vst.msk [vmem:[#allocation2] sm:$0x3] %vm61_vm2, %v360_v0  ;;  %vm86_vm3 = vcmask 261120   ;;  %v65_v20 = vld [vmem:[#allocation4] sm:$0xff]  ;;  %v133_v27 = vld [vmem:[#allocation9 + $0x18] sm:$0xff] }
  0x28   :  { %v111_v3 = vsel %vm110_vm1, %v68_v2, 0.0  ;;  %v132_v28 = vld [vmem:[#allocation9 + $0x10] sm:$0xff]  ;;  %244 = vmatpush3.msra.mxu0 %v133_v27  ;;  %vm362_vm4 = vmmov 0   ;;  %v131_v32 = vld [vmem:[#allocation9 + $0x8] sm:$0xff]  ;;  %v130_v35 = vld [vmem:[#allocation9] sm:$0xff]  ;;  %vm103_vm5 = vcmask 1041409  }
  0x29   :  { %112 = vadd.xlane.f32.xlu0 %v111_v3  ;;  %v79_v6 = vsub.s32 1, %v71_v5  ;;  %v72_v9 = vsub.s32 0, %v71_v5  ;;  %251 = vmatprep.mubr.msk.f32.mxu0 %vm362_vm4, %v360_v0  ;;  %v236_v47 = vld [vmem:[%s414_s3] ss:$0 sm:$0xff]  ;;  %s363_s5 = smov [#allocation10]  }
  0x2a   :  { %245 = vmatprep.subr.mxu0 %v360_v0  ;;  %s226_s6 = sshll.u32 %s363_s5, 4  ;;  %s227_s6 = int_to_ptr.vmem [resolvable:$true] %s226_s6 }
  0x2b   :  { %v80_v7 = vrot.slane %v68_v2, %v79_v6  ;;  %v73_v10 = vrot.slane %v68_v2, %v72_v9  ;;  %246 = vmatpush3.msra.mxu0 %v132_v28  ;;  %s329_s7 = scalar_lea.vmem %s227_s6, 32  ;;  %p334_p2 = scmp.lt.s32.totalorder %s227_s6, %s227_s6 }
  0x2c   :  { %247 = vmatprep.subr.mxu0 %v360_v0  ;;  %p330_p1 = scmp.ne.s32.totalorder %s227_s6, %s329_s7  ;;  %p335_p3 = scmp.lt.s32.totalorder %s329_s7, %s329_s7 }
  0x2d   :  { %82 = vbcast.lane.b32.xlu1 %v80_v7, 256  ;;  %v109_v16 = vld [vmem:[#allocation3] sm:$0x3]  ;;  %248 = vmatpush3.msra.mxu0 %v131_v32 }
  0x2e   :  { %249 = vmatprep.subr.mxu0 %v360_v0  ;;  %v69_v39 = vld [vmem:[#allocation2] sm:$0x3]  ;;  %p336_p4 = por %p335_p3, %p334_p2 }
  0x2f   :  { %250 = vmatpush3.msra.mxu0 %v130_v35 }
  0x30   :  { %p337_p5 = pnand %p336_p4, %p330_p1 }
  0x3f   :  { %75 = vbcast.lane.b32.xlu0 %v73_v10, 256 }
  0x9f   :  { %v83_v12 = vpop.permute.xlu1 %82 }
  0xa0   :  { %v85_v13 = vmul.f32 %v83_v12, %v66_v11 }
  0xa2   :  { %v94_v14 = vsel %vm86_vm3, %v85_v13, 0.0 }
  0xa3   :  { %v95_v15 = vrot.slane %v94_v14, 4 }
  0xa5   :  { %v96_v18 = vadd.f32 %v95_v15, %v94_v14 }
  0xa7   :  { %v97_v21 = vrot.slane %v96_v18, 2 }
  0xa9   :  { %v98_v25 = vadd.f32 %v97_v21, %v96_v18 }
  0xab   :  { %v99_v33 = vrot.slane %v98_v25, 1 }
  0xad   :  { %v100_v37 = vadd.f32 %v99_v33, %v98_v25 }
  0xb2   :  { %v113_v17 = vpop.xlane.xlu0 %112 }
  0xb3   :  { %v114_v19 = vadd.f32 %v113_v17, %v109_v16 }
  0xb5   :  { %116 = vst.msk [vmem:[#allocation3] sm:$0x3] %vm63_vm0, %v114_v19 }
  0xb6   :  { %v76_v22 = vpop.permute.xlu0 %75 }
  0xb7   :  { %v84_v23 = vmul.f32 %v76_v22, %v65_v20 }
  0xb9   :  { %v87_v24 = vsel %vm86_vm3, %v84_v23, 0.0 }
  0xba   :  { %v88_v26 = vrot.slane %v87_v24, 4 }
  0xbc   :  { %v121_v29 = vld [vmem:[#allocation3] sm:$0x3]  ;;  %v89_v30 = vadd.f32 %v88_v26, %v87_v24 }
  0xbd   :  { %v122_v31 = vmax.f32 %v121_v29, 1e-10 }
  0xbe   :  { %v90_v34 = vrot.slane %v89_v30, 2 }
  0xbf   :  { %125 = vperm.xlu1 %263, %v122_v31  }
  0xc0   :  { %v91_v36 = vadd.f32 %v90_v34, %v89_v30 }
  0xc2   :  { %v92_v38 = vrot.slane %v91_v36, 1 }
  0xc4   :  { %v93_v40 = vadd.f32 %v92_v38, %v91_v36 }
  0xc6   :  { %v104_v41 = vsel %vm103_vm5, %v100_v37, %v93_v40 }
  0xc7   :  { %v106_v42 = vadd.f32 %v104_v41, %v69_v39 }
  0xc9   :  { %108 = vst.msk [vmem:[#allocation2] sm:$0x3] %vm61_vm2, %v106_v42 }
  0xd0   :  { %v120_v45 = vld [vmem:[#allocation2] sm:$0x3] }
 0x13a   :  { %v126_v43 = vpop.permute.xlu1 %125 }
 0x13b   :  { %265 = vrcp.f32 %v126_v43 }
 0x148   :  { %v266_v44 = vpop.eup %265 }
 0x149   :  { %v129_v46 = vmul.f32 %v266_v44, %v120_v45 }
 0x14b   :  { %252 = vmatmul.mubr.msk.f32.vlgmr.msra.gmra.mxu0 %vm86_vm3, %v129_v46 }
 0x20b   :  { %v210_v48 = vpop.f32.mrf.mxu0 }
 0x20c   :  { %v211_v49 = vadd.f32 %v236_v47, %v210_v48 }
 0x20d   :  { %v253_v50 = vpop.f32.mrf.mxu0 }
 0x20e   :  { %v215_v51 = vmul.f32 0.70710677, %v211_v49  ;;  %v214_v53 = vmul.f32 0.5, %v211_v49 }
 0x210   :  { %267 = verf.f32 %v215_v51 }
 0x21d   :  { %v268_v52 = vpop.eup %267 }
 0x21e   :  { %v217_v54 = vadd.f32 1.0, %v268_v52 }
 0x220   :  { %v218_v55 = vmul.f32 %v217_v54, %v214_v53 }
 0x222   :  { %219 = vst [vmem:[#allocation10] sm:$0x3] %v218_v55 }
 0x223   :  { %340 = shalt.err (!%p337_p5)
}
 0x224   :  { %229 = dma.vmem_to_hbm [thread:$0]  %s227_s6, 32, %s415_s4, [#allocation6]  }
 0x225   :  { %353 = dma.done.wait [#allocation6], 32  }
 0x226   :  { %354 = vsyncadd [#allocation6], 4294967264 }
 0x227   :  { %233 = vsyncpa [#allocation5], 1 }
 0x228   :  { %234 = vsyncpa [#allocation8], 1 }
 0x229   :  { %235 = vsyncpa [#allocation6], 1 }

</bundles_post_ra>
